<compile_context>
chip_gen: v7x
topology: tpu7x:2x2x1
jax: 0.10.0
libtpu: 0.0.40
codegen_flags: <defaults>
</compile_context>

<pallas_src>
import functools

import jax
import jax.numpy as jnp
from jax.experimental import pallas as pl
from jax.experimental.pallas import tpu as pltpu


def _learned_loss_weights_kernel(xt_ref, w1_ref, params_ref, out_ref, *, beta):
    # xt_ref    : [N, B]  input, batch on the lane axis
    # w1_ref    : [H, N]  linear1 weight (PyTorch-native layout)
    # params_ref: [H, 2]  column 0 = b1, column 1 = w2 (linear2 weight row)
    # out_ref   : [1, B]  softmax weights, lane-dense row
    b1_col = params_ref[:, 0:1]          # [H, 1] static slice (free view)
    w2_col = params_ref[:, 1:2]          # [H, 1]

    # linear1 + relu on the MXU: h_T = relu(W1 @ x_T + b1)  -> [H, B]
    h = jnp.dot(w1_ref[...], xt_ref[...], preferred_element_type=jnp.float32)
    h = jnp.maximum(h + b1_col, 0.0)

    # linear2 (output width 1) with beta folded into the weight column:
    # s = beta * (h_T * w2).sum(sublane)  -> [1, B]   (VPU mul + XLU reduce)
    # (b2 omitted: a constant offset cancels in the batch softmax below.)
    s = jnp.sum(h * (w2_col * beta), axis=0, keepdims=True)

    # temperature softmax over the batch (lane axis), numerically stable
    m = jnp.max(s, axis=1, keepdims=True)
    e = jnp.exp(s - m)
    denom = jnp.sum(e, axis=1, keepdims=True)
    out_ref[...] = (e * pl.reciprocal(denom, approx=False)).astype(out_ref.dtype)


def learned_loss_weights(x, w1, params, beta=10.0):
    """x: [B, N] f32, w1: [H, N], params: [H, 2] (b1 | w2 row) -> weights [B]."""
    B, N = x.shape
    H = w1.shape[0]
    vmem = functools.partial(pl.BlockSpec, memory_space=pltpu.MemorySpace.VMEM)
    cost = pl.CostEstimate(
        flops=2 * B * N * H + 4 * B * H + 8 * B,   # matmul + mul/reduce + softmax
        transcendentals=B,                          # exp per batch element
        bytes_accessed=4 * (B * N + H * N + 2 * H + B),
    )
    out = pl.pallas_call(
        functools.partial(_learned_loss_weights_kernel, beta=float(beta)),
        out_shape=jax.ShapeDtypeStruct((1, B), jnp.float32),
        in_specs=[vmem(), vmem(), vmem()],
        out_specs=vmem(),
        cost_estimate=cost,
    )(x.T, w1, params)          # x.T: wrapper-side layout plumbing (batch -> lanes)
    # squeeze() in the PyTorch module -> [B]
    return out[0, :]


def init_params(key, input_size, hidden_size):
    """Deterministic PyTorch-style (uniform +/- 1/sqrt(fan_in)) initialization."""
    k1, k2, k3, k4 = jax.random.split(key, 4)
    bound1 = 1.0 / jnp.sqrt(jnp.float32(input_size))
    bound2 = 1.0 / jnp.sqrt(jnp.float32(hidden_size))
    w1 = jax.random.uniform(k1, (hidden_size, input_size), jnp.float32, -bound1, bound1)
    b1 = jax.random.uniform(k2, (hidden_size,), jnp.float32, -bound1, bound1)
    w2 = jax.random.uniform(k3, (1, hidden_size), jnp.float32, -bound2, bound2)
    b2 = jax.random.uniform(k4, (1,), jnp.float32, -bound2, bound2)
    # Pack b1 and the w2 row into one VMEM operand: [H, 2] (saves 2 input DMAs;
    # b2 is not passed to the kernel at all -- it cancels in the softmax).
    params = jnp.stack([b1, w2[0]], axis=1)
    return w1, b1, w2, b2, params


def reference(x, w1, b1, w2, b2, beta=10.0):
    """Pure-JAX reference with the FULL PyTorch math (including b2)."""
    h = jnp.maximum(x @ w1.T + b1, 0.0)
    z = h @ w2.T + b2                      # [B, 1]
    s = beta * z
    s = s - jnp.max(s, axis=0, keepdims=True)
    e = jnp.exp(s)
    return (e / jnp.sum(e, axis=0, keepdims=True))[:, 0]


if __name__ == "__main__":
    B, N, H = 8, 16, 32          # small shapes consistent with forward([B, N])
    beta = 10.0

    key = jax.random.PRNGKey(0)
    kx, kp = jax.random.split(key)
    x = jax.random.normal(kx, (B, N), jnp.float32)
    w1, b1, w2, b2, params = init_params(kp, N, H)

    weights = learned_loss_weights(x, w1, params, beta=beta)
    weights = jax.block_until_ready(weights)

    ref = reference(x, w1, b1, w2, b2, beta=beta)
    assert weights.shape == (B,)
    assert jnp.allclose(weights, ref, atol=1e-5, rtol=1e-5)
    assert jnp.allclose(jnp.sum(weights), 1.0, atol=1e-5)

    print("KERNEL_OK")
</pallas_src>

<mosaic_0001>
module attributes {stable_mosaic.version = 11 : i64} {
  func.func @_learned_loss_weights_kernel(%arg0: memref<16x8xf32, #tpu.memory_space<vmem>>, %arg1: memref<32x16xf32, #tpu.memory_space<vmem>>, %arg2: memref<32x2xf32, #tpu.memory_space<vmem>>, %arg3: memref<1x8xf32, #tpu.memory_space<vmem>>) attributes {dimension_semantics = [], scalar_prefetch = 0 : i64, scratch_operands = 0 : i64, tpu.core_type = #tpu.core_type<tc>} {
    %c0 = arith.constant 0 : index
    %c0_0 = arith.constant 0 : index
    %0 = vector.load %arg2[%c0, %c0_0] : memref<32x2xf32, #tpu.memory_space<vmem>>, vector<32x1xf32>
    %c0_1 = arith.constant 0 : index
    %c1 = arith.constant 1 : index
    %1 = vector.load %arg2[%c0_1, %c1] : memref<32x2xf32, #tpu.memory_space<vmem>>, vector<32x1xf32>
    %c0_2 = arith.constant 0 : index
    %c0_3 = arith.constant 0 : index
    %2 = vector.load %arg1[%c0_2, %c0_3] : memref<32x16xf32, #tpu.memory_space<vmem>>, vector<32x16xf32>
    %c0_4 = arith.constant 0 : index
    %c0_5 = arith.constant 0 : index
    %3 = vector.load %arg0[%c0_4, %c0_5] : memref<16x8xf32, #tpu.memory_space<vmem>>, vector<16x8xf32>
    %cst = arith.constant dense<0.000000e+00> : vector<32x8xf32>
    %4 = tpu.matmul %2, %3, %cst {dimension_numbers = #tpu.dot_dimension_numbers<[1], [0], [0], [1], [0, 0, 1, 1], [], []>} : vector<32x16xf32>, vector<16x8xf32>, vector<32x8xf32> -> vector<32x8xf32>
    %5 = vector.broadcast %0 : vector<32x1xf32> to vector<32x8xf32>
    %6 = arith.addf %4, %5 : vector<32x8xf32>
    %cst_6 = arith.constant 0.000000e+00 : f32
    %7 = vector.broadcast %cst_6 : f32 to vector<32x8xf32>
    %8 = arith.maximumf %6, %7 : vector<32x8xf32>
    %cst_7 = arith.constant 1.000000e+01 : f32
    %9 = vector.broadcast %cst_7 : f32 to vector<32x1xf32>
    %10 = arith.mulf %1, %9 : vector<32x1xf32>
    %11 = vector.broadcast %10 : vector<32x1xf32> to vector<32x8xf32>
    %12 = arith.mulf %8, %11 : vector<32x8xf32>
    %cst_8 = arith.constant dense<0.000000e+00> : vector<8xf32>
    %13 = vector.multi_reduction <add>, %12, %cst_8 [0] : vector<32x8xf32> to vector<8xf32>
    %14 = vector.shape_cast %13 : vector<8xf32> to vector<1x8xf32>
    %cst_9 = arith.constant dense<0xFF800000> : vector<1xf32>
    %15 = vector.multi_reduction <maximumf>, %14, %cst_9 [1] : vector<1x8xf32> to vector<1xf32>
    %16 = vector.shape_cast %15 : vector<1xf32> to vector<1x1xf32>
    %17 = vector.broadcast %16 : vector<1x1xf32> to vector<1x8xf32>
    %18 = arith.subf %14, %17 : vector<1x8xf32>
    %19 = math.exp %18 : vector<1x8xf32>
    %cst_10 = arith.constant dense<0.000000e+00> : vector<1xf32>
    %20 = vector.multi_reduction <add>, %19, %cst_10 [1] : vector<1x8xf32> to vector<1xf32>
    %21 = vector.shape_cast %20 : vector<1xf32> to vector<1x1xf32>
    %22 = tpu.reciprocal %21 : vector<1x1xf32> -> vector<1x1xf32>
    %23 = vector.broadcast %22 : vector<1x1xf32> to vector<1x8xf32>
    %24 = arith.mulf %19, %23 : vector<1x8xf32>
    %c0_11 = arith.constant 0 : index
    %c0_12 = arith.constant 0 : index
    %25 = vector.load %arg3[%c0_11, %c0_12] : memref<1x8xf32, #tpu.memory_space<vmem>>, vector<1x8xf32>
    tpu.vector_store %arg3[%c0_11, %c0_12], %24 {strides = array<i32>} : memref<1x8xf32, #tpu.memory_space<vmem>>, vector<1x8xf32>,
    return
  }
}

</mosaic_0001>

<bundles_post_ra>
// kernel: tpu_custom_call.1
= control target key start
LH: loop header
LB: loop body
LE: loop exit
PB: predicated region body
PF: predicated region fallthrough
CT: control target
= control target key end

     0   :  { %vm45_vm0 = vcmask 130048   ;;  %v277_v5 = vmov 0   ;;  %s352_s0 = inlined_call_operand.vmem [shape: f32[16,8], index: 0, kind: input, shape index: {}]   ;;  %s353_s1 = inlined_call_operand.vmem [shape: f32[32,16], index: 1, kind: input, shape index: {}]   ;;  %s354_s2 = inlined_call_operand.vmem [shape: f32[32,2], index: 2, kind: input, shape index: {}]   ;;  %s355_s3 = inlined_call_operand.hbm [shape: f32[1,8], index: 3, kind: output, shape index: {}]  }
   0x1   :  { %v23_v0 = vld [vmem:[%s352_s0] sm:$0xff]  ;;  %v24_v1 = vld [vmem:[%s352_s0 + $0x8] sm:$0xff]  ;;  %v21_v4 = vld [vmem:[%s353_s1 + $0x10] sm:$0xff]  ;;  %246 = vset.pattern.permute.xlu1 %v277_v5  ;;  %245 = vset.pattern.permute.xlu0 %v277_v5 }
   0x2   :  { %v19_v2 = vld [vmem:[%s353_s1] sm:$0xff]  ;;  %v236_v3 = vpack.c.bf16 %v24_v1, %v23_v0  ;;  %233 = vmatprep.mubr.msk.f32.mxu1 %vm45_vm0, %v21_v4  ;;  %v17_v6 = vld [vmem:[%s354_s2 + $0x10] sm:$0xff] }
   0x3   :  { %230 = vmatprep.mubr.msk.f32.mxu0 %vm45_vm0, %v19_v2  ;;  %v15_v7 = vld [vmem:[%s354_s2] sm:$0xff] }
   0x4   :  { %237 = vmatprep.subr.bf16.mxu0 %v236_v3  ;;  %240 = vmatprep.subr.bf16.mxu1 %v236_v3 }
   0x5   :  { %8 = vsyncpa [#allocation3], 0  ;;  %239 = vmatpush3.bf16.msra.mxu0 %v236_v3  ;;  %241 = vmatpush3.bf16.msra.mxu1 %v236_v3  ;;  %v20_v8 = vld [vmem:[%s353_s1 + $0x8] sm:$0xff]  ;;  %v22_v9 = vld [vmem:[%s353_s1 + $0x18] sm:$0xff]  ;;  %v147_v12 = vmul.f32 10.0, %v15_v7  ;;  %v278_v14 = vmov 1  }
   0x6   :  { %37 = vperm.xlu1 %246, %v17_v6   ;;  %27 = vperm.xlu0 %245, %v15_v7   ;;  %v18_v10 = vld [vmem:[%s354_s2 + $0x18] sm:$0xff]  ;;  %v16_v11 = vld [vmem:[%s354_s2 + $0x8] sm:$0xff]  ;;  %v149_v15 = vmul.f32 10.0, %v17_v6  ;;  %vm175_vm1 = vcmask 64512   ;;  %s279_s1 = smov [#allocation2]   ;;  %vm200_vm2 = vcmask 57344  }
   0x7   :  { %v148_v13 = vmul.f32 10.0, %v16_v11  ;;  %v150_v16 = vmul.f32 10.0, %v18_v10  ;;  %s208_s2 = sshll.u32 %s279_s1, 4  ;;  %s209_s2 = int_to_ptr.vmem [resolvable:$true] %s208_s2 }
   0x8   :  { %231 = vmatmul.mubr.msk.f32.vlgmr.msra.gmra.mrb[0].mxu0 %vm45_vm0, %v20_v8  ;;  %234 = vmatmul.mubr.msk.f32.vlgmr.msra.gmra.mrb[0].mxu1 %vm45_vm0, %v22_v9  ;;  %s253_s4 = scalar_lea.vmem %s209_s2, 16  ;;  %s257_s5 = scalar_lea.vmem %s209_s2, 32 }
   0x9   :  { %p254_p0 = scmp.ne.s32.totalorder %s209_s2, %s253_s4  ;;  %p258_p1 = scmp.lt.s32.totalorder %s209_s2, %s209_s2 }
   0xa   :  { %42 = vperm.xlu1 %246, %v18_v10   ;;  %32 = vperm.xlu0 %245, %v16_v11   ;;  %p259_p2 = scmp.lt.s32.totalorder %s257_s5, %s253_s4 }
   0xc   :  { %p260_p3 = por %p259_p2, %p258_p1 }
   0xe   :  { %248 = vset.pattern.permute.xlu1 %v278_v14  ;;  %247 = vset.pattern.permute.xlu0 %v278_v14  ;;  %p261_p4 = pnand %p260_p3, %p254_p0 }
   0xf   :  { %158 = vperm.xlu1 %248, %v148_v13   ;;  %153 = vperm.xlu0 %247, %v147_v12  }
  0x13   :  { %163 = vperm.xlu1 %248, %v149_v15   ;;  %168 = vperm.xlu0 %247, %v150_v16  }
  0x85   :  { %v38_v17 = vpop.permute.xlu1 %37  ;;  %v28_v18 = vpop.permute.xlu0 %27 }
  0x89   :  { %v43_v19 = vpop.permute.xlu1 %42  ;;  %v33_v20 = vpop.permute.xlu0 %32 }
  0x8e   :  { %v159_v21 = vpop.permute.xlu1 %158  ;;  %v154_v22 = vpop.permute.xlu0 %153 }
  0x92   :  { %v164_v36 = vpop.permute.xlu1 %163  ;;  %v169_v37 = vpop.permute.xlu0 %168 }
  0xdb   :  { %v232_v23 = vpop.f32.mrb[0].mxu0  ;;  %v235_v24 = vpop.f32.mrb[0].mxu1 }
  0xdc   :  { %v130_v25 = vadd.f32 %v232_v23, %v33_v20  ;;  %v140_v26 = vadd.f32 %v235_v24, %v43_v19  ;;  %v124_v27 = vpop.f32.mrb[1].mxu0  ;;  %v134_v28 = vpop.f32.mrb[1].mxu1 }
  0xdd   :  { %v125_v29 = vadd.f32 %v124_v27, %v28_v18  ;;  %v135_v30 = vadd.f32 %v134_v28, %v38_v17 }
  0xde   :  { %v144_v31 = vmax.f32 %v130_v25, 0.0  ;;  %v146_v32 = vmax.f32 %v140_v26, 0.0 }
  0xdf   :  { %v143_v33 = vmax.f32 %v125_v29, 0.0  ;;  %v145_v34 = vmax.f32 %v135_v30, 0.0 }
  0xe0   :  { %v172_v35 = vmul.f32 %v159_v21, %v144_v31  ;;  %v174_v42 = vmul.f32 %v169_v37, %v146_v32 }
  0xe1   :  { %v171_v38 = vmul.f32 %v154_v22, %v143_v33  ;;  %v173_v39 = vmul.f32 %v164_v36, %v145_v34 }
  0xe2   :  { %v177_v40 = vsel %vm175_vm1, %v172_v35, 0.0  ;;  %v181_v46 = vsel %vm175_vm1, %v174_v42, 0.0 }
  0xe3   :  { %v176_v41 = vsel %vm175_vm1, %v171_v38, 0.0  ;;  %v179_v44 = vsel %vm175_vm1, %v173_v39, 0.0 }
  0xe4   :  { %v178_v43 = vadd.f32 %v177_v40, %v176_v41 }
  0xe6   :  { %v180_v45 = vadd.f32 %v179_v44, %v178_v43 }
  0xe8   :  { %v182_v47 = vadd.f32 %v181_v46, %v180_v45 }
  0xea   :  { %v183_v48 = vrot.slane %v182_v47, 4 }
  0xec   :  { %v184_v49 = vadd.f32 %v183_v48, %v182_v47 }
  0xee   :  { %v185_v50 = vrot.slane %v184_v49, 2 }
  0xf0   :  { %v186_v51 = vadd.f32 %v185_v50, %v184_v49 }
  0xf2   :  { %v187_v52 = vrot.slane %v186_v51, 1 }
  0xf4   :  { %v188_v53 = vadd.f32 %v187_v52, %v186_v51 }
  0xf6   :  { %v189_v54 = vsel %vm175_vm1, %v188_v53, -inf }
  0xf7   :  { %190 = vmax.xlane.f32.xlu1 %v189_v54 }
 0x184   :  { %v191_v55 = vpop.xlane.xlu1 %190 }
 0x185   :  { %v192_v56 = vsub.f32 %v188_v53, %v191_v55 }
 0x187   :  { %v193_v57 = vmul.f32 1.442695, %v192_v56 }
 0x189   :  { %249 = vpow2.f32 %v193_v57 }
 0x193   :  { %v250_v58 = vpop.eup %249 }
 0x194   :  { %v195_v59 = vsel %vm175_vm1, %v250_v58, 0.0 }
 0x195   :  { %196 = vadd.xlane.f32.xlu0 %v195_v59 }
 0x222   :  { %v197_v60 = vpop.xlane.xlu0 %196 }
 0x223   :  { %251 = vrcp.f32 %v197_v60 }
 0x22d   :  { %v252_v61 = vpop.eup %251 }
 0x22e   :  { %v199_v62 = vmul.f32 %v252_v61, %v250_v58 }
 0x230   :  { %201 = vst.msk [vmem:[#allocation2] sm:$0x1] %vm200_vm2, %v199_v62 }
 0x231   :  { %264 = shalt.err (!%p261_p4)
}
 0x232   :  { %s265_s8 = scalar_lea.hbm %s355_s3, 16 }
 0x233   :  { %p266_p5 = scmp.ne.s32.totalorder %s355_s3, %s265_s8  ;;  %p269_p6 = scmp.lt.u32.totalorder %s265_s8, %s355_s3 }
 0x235   :  { %p271_p7 = pnand %p269_p6, %p266_p5 }
 0x237   :  { %274 = shalt.err (!%p271_p7)
}
 0x238   :  { %211 = dma.vmem_to_hbm [thread:$0]  %s209_s2, 16, %s355_s3, [#allocation3]  }
 0x239   :  { %275 = dma.done.wait [#allocation3], 16  }
 0x23a   :  { %276 = vsyncadd [#allocation3], 4294967280 }
 0x23b   :  { %215 = vsyncpa [#allocation3], 1 }

</bundles_post_ra>
